<compile_context>
chip_gen: v7x
topology: tpu7x:2x2x1
jax: 0.10.0
libtpu: 0.0.40
codegen_flags: <defaults>
</compile_context>

<pallas_src>
import jax
import jax.numpy as jnp
from jax.experimental import pallas as pl
from jax.experimental.pallas import tpu as pltpu


# ----------------------------------------------------------------------------
# Kernel
# ----------------------------------------------------------------------------
def period_type_encoding_kernel(frames_ref, x_ref, emb_ref, o_ref):
    """o = x + embedding[frames]   (dropout p=0 -> identity).

    frames_ref: (tn, 1) int32    indices into the embedding table
    x_ref:      (tn, D) float    activation row tile
    emb_ref:    (L,  D) float    full embedding weight (resident every step)
    o_ref:      (tn, D) float
    """
    frames = frames_ref[...]                                    # (tn, 1) int32
    tn = frames.shape[0]
    l = emb_ref.shape[0]

    # Row gather via one-hot matmul: single lane-aligned layout, runs on the
    # MXU; avoids per-row dynamic slices / lane-axis concats.
    iota = jax.lax.broadcasted_iota(jnp.int32, (tn, l), dimension=1)
    onehot = (iota == frames).astype(emb_ref.dtype)             # (tn, L)
    gathered = jnp.dot(onehot, emb_ref[...],
                       preferred_element_type=jnp.float32)      # (tn, D) f32

    o_ref[...] = (x_ref[...].astype(jnp.float32) + gathered).astype(o_ref.dtype)
    # TODO(synk): dropout with p > 0 (training mode) is not implemented; the
    # module's default p=0 makes dropout the identity, which is what we match.


# ----------------------------------------------------------------------------
# Wrapper
# ----------------------------------------------------------------------------
def period_type_encoding(x, frames_map, embedding, *, row_tile=512):
    """Pallas equivalent of PeriodTypeEncoding.forward(x, frames_map).

    x:          (B, S, D) float
    frames_map: (B, S)    integer indices in [0, max_len)
    embedding:  (max_len, D) float embedding weight
    """
    B, S, D = x.shape
    L = embedding.shape[0]
    N = B * S

    # Flatten batch*seq into one row axis.
    x2 = x.reshape(N, D)
    fm = frames_map.reshape(N, 1).astype(jnp.int32)

    # Pick a sublane(8)-aligned row tile; degenerate to a single full block
    # when everything is tiny.
    if N <= row_tile:
        tn = N
    else:
        tn = max(8, (row_tile // 8) * 8)

    pad = (-N) % tn
    if pad:
        # Padded rows index embedding row 0 and add zeros; they are sliced off
        # below, so correctness is unaffected.
        x2 = jnp.pad(x2, ((0, pad), (0, 0)))
        fm = jnp.pad(fm, ((0, pad), (0, 0)))
    n_padded = N + pad
    grid = (n_padded // tn,)

    out = pl.pallas_call(
        period_type_encoding_kernel,
        out_shape=jax.ShapeDtypeStruct((n_padded, D), x.dtype),
        grid=grid,
        in_specs=[
            pl.BlockSpec((tn, 1), lambda i: (i, 0)),   # frames (row tile)
            pl.BlockSpec((tn, D), lambda i: (i, 0)),   # x      (row tile)
            pl.BlockSpec((L, D), lambda i: (0, 0)),    # embedding (resident)
        ],
        out_specs=pl.BlockSpec((tn, D), lambda i: (i, 0)),
        compiler_params=pltpu.CompilerParams(
            dimension_semantics=("parallel",)),
    )(fm, x2, embedding)

    return out[:N].reshape(B, S, D)


# ----------------------------------------------------------------------------
# Main
# ----------------------------------------------------------------------------
if __name__ == "__main__":
    # Small, module-consistent shapes.
    B, S = 2, 8          # batch, sequence
    d_model = 32         # embedding / model width
    max_len = 16         # number of period types (embedding rows)

    key = jax.random.PRNGKey(0)
    kx, kf, ke = jax.random.split(key, 3)

    x = jax.random.normal(kx, (B, S, d_model), jnp.float32)
    frames_map = jax.random.randint(kf, (B, S), 0, max_len, jnp.int32)
    embedding = 0.02 * jax.random.normal(ke, (max_len, d_model), jnp.float32)

    out = period_type_encoding(x, frames_map, embedding)
    out = jax.block_until_ready(out)

    # Pure-JAX reference: x + embeddings(frames_map), dropout(p=0) = identity.
    ref = x + embedding[frames_map]

    assert out.shape == (B, S, d_model)
    assert bool(jnp.all(jnp.isfinite(out)))
    assert bool(jnp.allclose(out, ref, atol=1e-6, rtol=1e-6))
    print("KERNEL_OK")
</pallas_src>

<mosaic_0001>
module attributes {stable_mosaic.version = 11 : i64} {
  func.func @period_type_encoding_kernel(%arg0: i32, %arg1: memref<16x1xi32, #tpu.memory_space<vmem>>, %arg2: memref<16x32xf32, #tpu.memory_space<vmem>>, %arg3: memref<16x32xf32, #tpu.memory_space<vmem>>, %arg4: memref<16x32xf32, #tpu.memory_space<vmem>>) attributes {dimension_semantics = [#tpu.dimension_semantics<parallel>], iteration_bounds = array<i64: 1>, scalar_prefetch = 0 : i64, scratch_operands = 0 : i64, tpu.core_type = #tpu.core_type<tc>, window_params = [{transform_indices = @transform_0, window_bounds = array<i64: 16, 1>}, {transform_indices = @transform_1, window_bounds = array<i64: 16, 32>}, {pipeline_mode = #tpu.pipeline_mode<synchronous>, transform_indices = @transform_2, window_bounds = array<i64: 16, 32>}, {transform_indices = @transform_3, window_bounds = array<i64: 16, 32>}]} {
    %c0 = arith.constant 0 : index
    %c0_0 = arith.constant 0 : index
    %0 = vector.load %arg1[%c0, %c0_0] : memref<16x1xi32, #tpu.memory_space<vmem>>, vector<16x1xi32>
    %1 = tpu.iota {dimensions = array<i32: 1>} : vector<16x16xi32>
    %2 = vector.broadcast %0 : vector<16x1xi32> to vector<16x16xi32>
    %3 = arith.cmpi eq, %1, %2 : vector<16x16xi32>
    %4 = arith.extui %3 : vector<16x16xi1> to vector<16x16xi32>
    %5 = arith.sitofp %4 : vector<16x16xi32> to vector<16x16xf32>
    %c0_1 = arith.constant 0 : index
    %c0_2 = arith.constant 0 : index
    %6 = vector.load %arg3[%c0_1, %c0_2] : memref<16x32xf32, #tpu.memory_space<vmem>>, vector<16x32xf32>
    %cst = arith.constant dense<0.000000e+00> : vector<16x32xf32>
    %7 = tpu.matmul %5, %6, %cst {dimension_numbers = #tpu.dot_dimension_numbers<[1], [0], [0], [1], [0, 0, 1, 1], [], []>} : vector<16x16xf32>, vector<16x32xf32>, vector<16x32xf32> -> vector<16x32xf32>
    %c0_3 = arith.constant 0 : index
    %c0_4 = arith.constant 0 : index
    %8 = vector.load %arg2[%c0_3, %c0_4] : memref<16x32xf32, #tpu.memory_space<vmem>>, vector<16x32xf32>
    %9 = arith.addf %8, %7 : vector<16x32xf32>
    %c0_5 = arith.constant 0 : index
    %c0_6 = arith.constant 0 : index
    %10 = vector.load %arg4[%c0_5, %c0_6] : memref<16x32xf32, #tpu.memory_space<vmem>>, vector<16x32xf32>
    tpu.vector_store %arg4[%c0_5, %c0_6], %9 {strides = array<i32>} : memref<16x32xf32, #tpu.memory_space<vmem>>, vector<16x32xf32>,
    return
  }
  func.func @transform_0(%arg0: i32) -> (i32, i32) {
    %c0_i32 = arith.constant 0 : i32
    %c0_i32_0 = arith.constant 0 : i32
    return %arg0, %c0_i32 : i32, i32
  }
  func.func @transform_1(%arg0: i32) -> (i32, i32) {
    %c0_i32 = arith.constant 0 : i32
    %c0_i32_0 = arith.constant 0 : i32
    return %arg0, %c0_i32 : i32, i32
  }
  func.func @transform_2(%arg0: i32) -> (i32, i32) {
    %c0_i32 = arith.constant 0 : i32
    %c0_i32_0 = arith.constant 0 : i32
    %c0_i32_1 = arith.constant 0 : i32
    return %c0_i32, %c0_i32_0 : i32, i32
  }
  func.func @transform_3(%arg0: i32) -> (i32, i32) {
    %c0_i32 = arith.constant 0 : i32
    %c0_i32_0 = arith.constant 0 : i32
    return %arg0, %c0_i32 : i32, i32
  }
}

</mosaic_0001>

<bundles_post_ra>
// kernel: tpu_custom_call.1
= control target key start
LH: loop header
LB: loop body
LE: loop exit
PB: predicated region body
PF: predicated region fallthrough
CT: control target
= control target key end

     0   :  { %8 = vsyncpa [#allocation3], 0  ;;  %s295_s0 = inlined_call_operand.vmem [shape: s32[16,1], index: 0, kind: input, shape index: {}]   ;;  %s296_s1 = inlined_call_operand.vmem [shape: f32[16,32], index: 1, kind: input, shape index: {}]   ;;  %s297_s2 = inlined_call_operand.hbm [shape: f32[16,32], index: 2, kind: input, shape index: {}]   ;;  %s298_s3 = inlined_call_operand.hbm [shape: f32[16,32], index: 3, kind: output, shape index: {}]  }
   0x1   :  { %9 = vsyncpa [#allocation4], 0  ;;  %s227_s12 = smov [#allocation2]   ;;  %s179_s16 = scalar_lea.hbm %s297_s2, 256 }
   0x2   :  { %s19_s13 = sshll.u32 %s227_s12, 4  ;;  %p180_p0 = scmp.ne.s32.totalorder %s297_s2, %s179_s16  ;;  %s20_s13 = int_to_ptr.vmem [resolvable:$true] %s19_s13 }
   0x3   :  { %p183_p1 = scmp.lt.u32.totalorder %s179_s16, %s297_s2 }
   0x5   :  { %p185_p2 = pnand %p183_p1, %p180_p0 }
   0x7   :  { %188 = shalt.err (!%p185_p2)
}
   0x8   :  { %s189_s21 = scalar_lea.vmem %s20_s13, 256  ;;  %p194_p4 = scmp.lt.s32.totalorder %s20_s13, %s20_s13 }
   0x9   :  { %p190_p3 = scmp.ne.s32.totalorder %s20_s13, %s189_s21  ;;  %p195_p5 = scmp.lt.s32.totalorder %s189_s21, %s189_s21 }
   0xb   :  { %p196_p6 = por %p195_p5, %p194_p4 }
   0xd   :  { %p197_p7 = pnand %p196_p6, %p190_p3 }
   0xf   :  { %200 = shalt.err (!%p197_p7)
}
  0x10   :  { %s228_s22 = smov 128   ;;  %s229_s23 = smov 8  }
  0x11   :  { %25 = dma.hbm_to_vmem [thread:$0]  %s297_s2, 256, %s20_s13, [#allocation3], %s228_s22, %s228_s22, %s229_s23  }
  0x12   :  { %223 = dma.done.wait [#allocation3], 256  }
  0x13   :  { %224 = vsyncadd [#allocation3], 4294967040  ;;  %v230_v0 = vmov 0   ;;  %v29_v1 = vld [vmem:[%s295_s0] sm:$0xff]  ;;  %v46_v3 = vld [vmem:[#allocation2 + $0x8] sm:$0xff]  ;;  %v31_v6 = vlaneseq  ;;  %vm47_vm0 = vcmask 130048  }
  0x14   :  { %178 = vset.pattern.permute.xlu0 %v230_v0  ;;  %v45_v2 = vld [vmem:[#allocation2] sm:$0xff]  ;;  %v30_v4 = vld [vmem:[%s295_s0 + $0x8] sm:$0xff]  ;;  %v231_v9 = vmov 0.0   ;;  %s232_s5 = smov [#allocation5]   ;;  %vm133_vm3 = vcmask 261120  }
  0x15   :  { %34 = vperm.xlu0 %178, %v29_v1   ;;  %v168_v5 = vpack.c.bf16 %v46_v3, %v45_v2  ;;  %v32_v7 = vand.u32 127, %v31_v6  ;;  %v130_v13 = vld [vmem:[%s296_s1 + $0x8] sm:$0xff]  ;;  %v129_v14 = vld [vmem:[%s296_s1] sm:$0xff]  ;;  %s141_s6 = sshll.u32 %s232_s5, 4  ;;  %s142_s6 = int_to_ptr.vmem [resolvable:$true] %s141_s6 }
  0x16   :  { %s201_s7 = scalar_lea.vmem %s142_s6, 256  ;;  %p206_p9 = scmp.lt.s32.totalorder %s142_s6, %s142_s6 }
  0x17   :  { %169 = vmatprep.subr.bf16.mxu0 %v168_v5  ;;  %p202_p8 = scmp.ne.s32.totalorder %s142_s6, %s201_s7  ;;  %p207_p10 = scmp.lt.s32.totalorder %s201_s7, %s201_s7 }
  0x18   :  { %171 = vmatpush3.bf16.msra.mxu0 %v168_v5 }
  0x19   :  { %37 = vperm.xlu0 %178, %v30_v4   ;;  %p208_p11 = por %p207_p10, %p206_p9 }
  0x1b   :  { %p209_p12 = pnand %p208_p11, %p202_p8 }
  0x94   :  { %v35_v8 = vpop.permute.xlu0 %34 }
  0x95   :  { %vm39_vm1 = vcmp.eq.s32.totalorder %v32_v7, %v35_v8 }
  0x96   :  { %v153_v10 = vsel %vm39_vm1, 1.0, %v231_v9 }
  0x97   :  { %165 = vmatprep.mubr.msk.f32.mxu0 %vm47_vm0, %v153_v10 }
  0x98   :  { %v38_v11 = vpop.permute.xlu0 %37 }
  0x99   :  { %vm40_vm2 = vcmp.eq.s32.totalorder %v32_v7, %v38_v11 }
  0x9a   :  { %v154_v12 = vsel %vm40_vm2, 1.0, %v231_v9 }
  0x9b   :  { %166 = vmatmul.mubr.msk.f32.vlgmr.msra.gmra.mrb[0].mxu0 %vm47_vm0, %v154_v12 }
 0x16e   :  { %v167_v15 = vpop.f32.mrb[0].mxu0 }
 0x16f   :  { %v132_v16 = vadd.f32 %v167_v15, %v130_v13  ;;  %v120_v17 = vpop.f32.mrb[1].mxu0 }
 0x170   :  { %v131_v18 = vadd.f32 %v129_v14, %v120_v17 }
 0x171   :  { %135 = vst.msk [vmem:[#allocation5 + $0x8] sm:$0xff] %vm133_vm3, %v132_v16 }
 0x172   :  { %134 = vst.msk [vmem:[#allocation5] sm:$0xff] %vm133_vm3, %v131_v18 }
 0x173   :  { %212 = shalt.err (!%p209_p12)
}
 0x174   :  { %s213_s1 = scalar_lea.hbm %s298_s3, 256 }
 0x175   :  { %p214_p13 = scmp.ne.s32.totalorder %s298_s3, %s213_s1  ;;  %p217_p0 = scmp.lt.u32.totalorder %s213_s1, %s298_s3 }
 0x177   :  { %p219_p1 = pnand %p217_p0, %p214_p13 }
 0x179   :  { %222 = shalt.err (!%p219_p1)
}
 0x17a   :  { %147 = dma.vmem_to_hbm [thread:$0]  %s142_s6, 256, %s298_s3, [#allocation4], %s228_s22, %s228_s22, %s229_s23  }
 0x17b   :  { %225 = dma.done.wait [#allocation4], 256  }
 0x17c   :  { %226 = vsyncadd [#allocation4], 4294967040 }
 0x17d   :  { %151 = vsyncpa [#allocation3], 1 }
 0x17e   :  { %152 = vsyncpa [#allocation4], 1 }

</bundles_post_ra>
